<compile_context>
chip_gen: v7x
topology: tpu7x:2x2x1
jax: 0.10.0
libtpu: 0.0.40
codegen_flags: <defaults>
</compile_context>

<pallas_src>
import functools

import jax
import jax.numpy as jnp
from jax.experimental import pallas as pl
from jax.experimental.pallas import tpu as pltpu


def _attention_kernel(inp_ref, enc_ref, bias_ref, win_ref, wctx_ref, winp_ref,
                      out_ref, attn_ref):
    bb, t, e_in = inp_ref.shape

    inp = inp_ref[...]          # (Bb, T, E_in)   compute dtype
    enc = enc_ref[...]          # (Bb, S, E_src)  compute dtype
    bias = bias_ref[...]        # (Bb, 1, S)      f32 additive mask (0 / -1e30)

    # ---- input_proj: flatten (Bb*T) into the MXU M dimension --------------
    inp2 = inp.reshape(bb * t, e_in)                       # (Bb*T, E_in)
    x2 = jnp.dot(inp2, win_ref[...], preferred_element_type=jnp.float32)
    x = x2.reshape(bb, t, -1)                              # (Bb, T, E_src) f32

    # ---- attention scores: batched, contract last dims (no enc.T) ---------
    scores = jnp.einsum("bte,bse->bts", x.astype(enc.dtype), enc,
                        preferred_element_type=jnp.float32)   # (Bb, T, S) f32
    scores = scores + bias                                     # additive mask

    # ---- softmax in f32 (VPU/EUP) ------------------------------------------
    m = jnp.max(scores, axis=-1, keepdims=True)
    e = jnp.exp(scores - m)
    denom = jnp.sum(e, axis=-1, keepdims=True)
    p = e * pl.reciprocal(denom, approx=True)              # EUP vrcp
    attn_ref[...] = p.astype(attn_ref.dtype)

    # ---- context: p @ enc (batched standard matmul) ------------------------
    ctx = jnp.einsum("bts,bse->bte", p.astype(enc.dtype), enc,
                     preferred_element_type=jnp.float32)   # (Bb, T, E_src)

    # ---- output_proj on cat([ctx, inp]) == ctx@Wc + inp@Wi, flattened M ----
    out2 = jnp.tanh(
        jnp.dot(ctx.reshape(bb * t, -1).astype(wctx_ref.dtype), wctx_ref[...],
                preferred_element_type=jnp.float32)
        + jnp.dot(inp2, winp_ref[...], preferred_element_type=jnp.float32))
    out_ref[...] = out2.reshape(bb, t, -1).astype(out_ref.dtype)


def _pick_batch_block(B, T, S, E_in, E_src, E_out, itemsize=4,
                      vmem_budget_bytes=10 * 1024 * 1024):
    """Largest Bb dividing B whose double-buffered tiles fit the VMEM budget."""
    per_b = 2 * itemsize * (T * E_in + S * E_src + S + T * S + T * E_out)
    bb = max(1, min(B, vmem_budget_bytes // per_b))
    while B % bb:               # avoid partial (masked-store) tail blocks
        bb -= 1
    # v7x has 2 TensorCores: keep >= 2 parallel grid steps when that still
    # leaves a healthy matmul M (= Bb*T >= 128 rows).
    if bb == B and B > 1 and (B // 2) * T >= 128:
        half = B // 2
        while B % half:
            half -= 1
        bb = half
    return bb


@functools.partial(jax.jit, static_argnames=("compute_dtype",))
def attention_layer(inputs_tbf, enc_sbf, pad_mask_sb, w_in, w_out,
                    compute_dtype=jnp.float32):
    """inputs_tbf: (T, B, E_in), enc_sbf: (S, B, E_src), pad_mask_sb: (S, B) bool.
    w_in: (E_src, E_in), w_out: (E_out, E_src + E_in) in PyTorch (out,in) layout
    with columns ordered [ctx(E_src), inputs(E_in)] to match the concat order.
    Returns (out (T, B, E_out), attn (B, T, S))."""
    T, B, E_in = inputs_tbf.shape
    S, _, E_src = enc_sbf.shape
    E_out = w_out.shape[0]

    # Batch-major activations for the batched MXU matmuls.
    inp = jnp.transpose(inputs_tbf, (1, 0, 2)).astype(compute_dtype)  # (B,T,E_in)
    enc = jnp.transpose(enc_sbf, (1, 0, 2)).astype(compute_dtype)     # (B,S,E_src)

    # Additive padding mask: 0 where valid, -1e30 where padded.
    # exp(-1e30 - m) underflows to exactly 0, matching masked_fill(-inf) for
    # any row with at least one unmasked position (fully-masked rows would be
    # NaN in PyTorch; here they become uniform -- see TODO below).
    # TODO(synk): fully-padded source rows differ from PyTorch's NaN output.
    bias = jnp.where(jnp.transpose(pad_mask_sb, (1, 0)),
                     jnp.float32(-1e30), jnp.float32(0.0)).reshape(B, 1, S)

    w_in_t = jnp.transpose(w_in).astype(compute_dtype)                # (E_in, E_src)
    w_ctx_t = jnp.transpose(w_out[:, :E_src]).astype(compute_dtype)   # (E_src, E_out)
    w_inp_t = jnp.transpose(w_out[:, E_src:]).astype(compute_dtype)   # (E_in, E_out)

    itemsize = jnp.dtype(compute_dtype).itemsize
    bb = _pick_batch_block(B, T, S, E_in, E_src, E_out, itemsize=itemsize)
    grid = (B // bb,)

    flops = 2 * B * T * (E_in * E_src + 2 * S * E_src
                         + E_src * E_out + E_in * E_out)
    transcendentals = B * T * (S + E_out + 1)
    bytes_accessed = (itemsize * (B * T * E_in + B * S * E_src
                                  + E_in * E_src + (E_in + E_src) * E_out)
                      + 4 * (B * S + B * T * S + B * T * E_out))

    out_bto, attn_bts = pl.pallas_call(
        _attention_kernel,
        out_shape=(
            jax.ShapeDtypeStruct((B, T, E_out), jnp.float32),
            jax.ShapeDtypeStruct((B, T, S), jnp.float32),
        ),
        grid_spec=pltpu.PrefetchScalarGridSpec(
            num_scalar_prefetch=0,
            grid=grid,
            in_specs=[
                pl.BlockSpec((bb, T, E_in), lambda b: (b, 0, 0)),
                pl.BlockSpec((bb, S, E_src), lambda b: (b, 0, 0)),
                pl.BlockSpec((bb, 1, S), lambda b: (b, 0, 0)),
                pl.BlockSpec((E_in, E_src), lambda b: (0, 0)),
                pl.BlockSpec((E_src, E_out), lambda b: (0, 0)),
                pl.BlockSpec((E_in, E_out), lambda b: (0, 0)),
            ],
            out_specs=[
                pl.BlockSpec((bb, T, E_out), lambda b: (b, 0, 0)),
                pl.BlockSpec((bb, T, S), lambda b: (b, 0, 0)),
            ],
        ),
        compiler_params=pltpu.CompilerParams(
            dimension_semantics=("parallel",)),
        cost_estimate=pl.CostEstimate(
            flops=flops,
            transcendentals=transcendentals,
            bytes_accessed=bytes_accessed),
    )(inp, enc, bias, w_in_t, w_ctx_t, w_inp_t)

    out_tbo = jnp.transpose(out_bto, (1, 0, 2))  # (T, B, E_out)
    return out_tbo, attn_bts


def _reference(inputs_tbf, enc_sbf, pad_mask_sb, w_in, w_out):
    """Pure-JAX reference matching the PyTorch forward exactly."""
    inp = jnp.transpose(inputs_tbf, (1, 0, 2))
    enc = jnp.transpose(enc_sbf, (1, 0, 2))
    mask = jnp.transpose(pad_mask_sb, (1, 0))
    x = jnp.einsum("btd,ed->bte", inp, w_in)
    scores = jnp.einsum("bte,bse->bts", x, enc)
    scores = jnp.where(mask[:, None, :], -jnp.inf, scores)
    scores = jax.nn.softmax(scores, axis=-1)
    ctx = jnp.einsum("bts,bse->bte", scores, enc)
    cat = jnp.concatenate([ctx, inp], axis=-1)
    out = jnp.tanh(jnp.einsum("btc,oc->bto", cat, w_out))
    return jnp.transpose(out, (1, 0, 2)), scores


if __name__ == "__main__":
    T, S, B = 8, 8, 2
    E_in, E_src, E_out = 32, 32, 32

    key = jax.random.PRNGKey(0)
    k1, k2, k3, k4 = jax.random.split(key, 4)

    inputs = jax.random.normal(k1, (T, B, E_in), dtype=jnp.float32)
    encoder_outputs = jax.random.normal(k2, (S, B, E_src), dtype=jnp.float32)
    # deterministic padding mask: last 2 source positions padded for batch 1
    pad_mask = jnp.zeros((S, B), dtype=bool).at[S - 2:, 1].set(True)

    # deterministic "parameters" (nn.Linear weights, bias=False)
    w_in = 0.1 * jax.random.normal(k3, (E_src, E_in), dtype=jnp.float32)
    w_out = 0.1 * jax.random.normal(k4, (E_out, E_in + E_src), dtype=jnp.float32)

    out, attn = attention_layer(inputs, encoder_outputs, pad_mask, w_in, w_out)
    out = jax.block_until_ready(out)
    attn = jax.block_until_ready(attn)

    ref_out, ref_attn = _reference(inputs, encoder_outputs, pad_mask, w_in, w_out)
    assert out.shape == (T, B, E_out) and attn.shape == (B, T, S)
    # Tolerance loosened vs. bit-exact because of pl.reciprocal(approx=True)
    # in the softmax denominator (EUP approximation, ~1e-4 relative).
    assert jnp.allclose(out, ref_out, atol=3e-3, rtol=3e-3)
    assert jnp.allclose(attn, ref_attn, atol=3e-3, rtol=3e-3)

    print("KERNEL_OK")
</pallas_src>

<mosaic_0001>
module attributes {stable_mosaic.version = 11 : i64} {
  func.func @_attention_kernel(%arg0: i32, %arg1: memref<2x8x32xf32, #tpu.memory_space<vmem>>, %arg2: memref<2x8x32xf32, #tpu.memory_space<vmem>>, %arg3: memref<2x1x8xf32, #tpu.memory_space<vmem>>, %arg4: memref<32x32xf32, #tpu.memory_space<vmem>>, %arg5: memref<32x32xf32, #tpu.memory_space<vmem>>, %arg6: memref<32x32xf32, #tpu.memory_space<vmem>>, %arg7: memref<2x8x32xf32, #tpu.memory_space<vmem>>, %arg8: memref<2x8x8xf32, #tpu.memory_space<vmem>>) attributes {dimension_semantics = [#tpu.dimension_semantics<parallel>], iteration_bounds = array<i64: 1>, scalar_prefetch = 0 : i64, scratch_operands = 0 : i64, tpu.core_type = #tpu.core_type<tc>, window_params = [{transform_indices = @transform_0, window_bounds = array<i64: 2, 8, 32>}, {transform_indices = @transform_1, window_bounds = array<i64: 2, 8, 32>}, {transform_indices = @transform_2, window_bounds = array<i64: 2, 1, 8>}, {pipeline_mode = #tpu.pipeline_mode<synchronous>, transform_indices = @transform_3, window_bounds = array<i64: 32, 32>}, {pipeline_mode = #tpu.pipeline_mode<synchronous>, transform_indices = @transform_4, window_bounds = array<i64: 32, 32>}, {pipeline_mode = #tpu.pipeline_mode<synchronous>, transform_indices = @transform_5, window_bounds = array<i64: 32, 32>}, {transform_indices = @transform_6, window_bounds = array<i64: 2, 8, 32>}, {transform_indices = @transform_7, window_bounds = array<i64: 2, 8, 8>}]} {
    %c0 = arith.constant 0 : index
    %c0_0 = arith.constant 0 : index
    %c0_1 = arith.constant 0 : index
    %0 = vector.load %arg1[%c0, %c0_0, %c0_1] : memref<2x8x32xf32, #tpu.memory_space<vmem>>, vector<2x8x32xf32>
    %c0_2 = arith.constant 0 : index
    %c0_3 = arith.constant 0 : index
    %c0_4 = arith.constant 0 : index
    %1 = vector.load %arg2[%c0_2, %c0_3, %c0_4] : memref<2x8x32xf32, #tpu.memory_space<vmem>>, vector<2x8x32xf32>
    %c0_5 = arith.constant 0 : index
    %c0_6 = arith.constant 0 : index
    %c0_7 = arith.constant 0 : index
    %2 = vector.load %arg3[%c0_5, %c0_6, %c0_7] : memref<2x1x8xf32, #tpu.memory_space<vmem>>, vector<2x1x8xf32>
    %3 = vector.shape_cast %0 : vector<2x8x32xf32> to vector<16x32xf32>
    %c0_8 = arith.constant 0 : index
    %c0_9 = arith.constant 0 : index
    %4 = vector.load %arg4[%c0_8, %c0_9] : memref<32x32xf32, #tpu.memory_space<vmem>>, vector<32x32xf32>
    %cst = arith.constant dense<0.000000e+00> : vector<16x32xf32>
    %5 = tpu.matmul %3, %4, %cst {dimension_numbers = #tpu.dot_dimension_numbers<[1], [0], [0], [1], [0, 0, 1, 1], [], []>} : vector<16x32xf32>, vector<32x32xf32>, vector<16x32xf32> -> vector<16x32xf32>
    %6 = vector.shape_cast %5 : vector<16x32xf32> to vector<2x8x32xf32>
    "tpu.trace_start"() <{level = 10 : i32, message = "bte,bse->bts"}> : () -> ()
    %cst_10 = arith.constant dense<0.000000e+00> : vector<2x8x8xf32>
    %7 = tpu.matmul %6, %1, %cst_10 {dimension_numbers = #tpu.dot_dimension_numbers<[2], [2], [1], [1], [0, 0, 0, 1, 1, 1], [0], [0]>} : vector<2x8x32xf32>, vector<2x8x32xf32>, vector<2x8x8xf32> -> vector<2x8x8xf32>
    "tpu.trace_stop"() : () -> ()
    %8 = vector.broadcast %2 : vector<2x1x8xf32> to vector<2x8x8xf32>
    %9 = arith.addf %7, %8 : vector<2x8x8xf32>
    %cst_11 = arith.constant dense<0xFF800000> : vector<2x8xf32>
    %10 = vector.multi_reduction <maximumf>, %9, %cst_11 [2] : vector<2x8x8xf32> to vector<2x8xf32>
    %11 = vector.shape_cast %10 : vector<2x8xf32> to vector<2x8x1xf32>
    %12 = vector.broadcast %11 : vector<2x8x1xf32> to vector<2x8x8xf32>
    %13 = arith.subf %9, %12 : vector<2x8x8xf32>
    %14 = math.exp %13 : vector<2x8x8xf32>
    %cst_12 = arith.constant dense<0.000000e+00> : vector<2x8xf32>
    %15 = vector.multi_reduction <add>, %14, %cst_12 [2] : vector<2x8x8xf32> to vector<2x8xf32>
    %16 = vector.shape_cast %15 : vector<2x8xf32> to vector<2x8x1xf32>
    %17 = tpu.reciprocal %16 {approx = true} : vector<2x8x1xf32> -> vector<2x8x1xf32>
    %18 = vector.broadcast %17 : vector<2x8x1xf32> to vector<2x8x8xf32>
    %19 = arith.mulf %14, %18 : vector<2x8x8xf32>
    %c0_13 = arith.constant 0 : index
    %c0_14 = arith.constant 0 : index
    %c0_15 = arith.constant 0 : index
    %20 = vector.load %arg8[%c0_13, %c0_14, %c0_15] : memref<2x8x8xf32, #tpu.memory_space<vmem>>, vector<2x8x8xf32>
    tpu.vector_store %arg8[%c0_13, %c0_14, %c0_15], %19 {strides = array<i32>} : memref<2x8x8xf32, #tpu.memory_space<vmem>>, vector<2x8x8xf32>,
    "tpu.trace_start"() <{level = 10 : i32, message = "bts,bse->bte"}> : () -> ()
    %cst_16 = arith.constant dense<0.000000e+00> : vector<2x8x32xf32>
    %21 = tpu.matmul %19, %1, %cst_16 {dimension_numbers = #tpu.dot_dimension_numbers<[2], [1], [1], [2], [0, 0, 0, 1, 1, 2], [0], [0]>} : vector<2x8x8xf32>, vector<2x8x32xf32>, vector<2x8x32xf32> -> vector<2x8x32xf32>
    "tpu.trace_stop"() : () -> ()
    %22 = vector.shape_cast %21 : vector<2x8x32xf32> to vector<16x32xf32>
    %c0_17 = arith.constant 0 : index
    %c0_18 = arith.constant 0 : index
    %23 = vector.load %arg5[%c0_17, %c0_18] : memref<32x32xf32, #tpu.memory_space<vmem>>, vector<32x32xf32>
    %cst_19 = arith.constant dense<0.000000e+00> : vector<16x32xf32>
    %24 = tpu.matmul %22, %23, %cst_19 {dimension_numbers = #tpu.dot_dimension_numbers<[1], [0], [0], [1], [0, 0, 1, 1], [], []>} : vector<16x32xf32>, vector<32x32xf32>, vector<16x32xf32> -> vector<16x32xf32>
    %c0_20 = arith.constant 0 : index
    %c0_21 = arith.constant 0 : index
    %25 = vector.load %arg6[%c0_20, %c0_21] : memref<32x32xf32, #tpu.memory_space<vmem>>, vector<32x32xf32>
    %cst_22 = arith.constant dense<0.000000e+00> : vector<16x32xf32>
    %26 = tpu.matmul %3, %25, %cst_22 {dimension_numbers = #tpu.dot_dimension_numbers<[1], [0], [0], [1], [0, 0, 1, 1], [], []>} : vector<16x32xf32>, vector<32x32xf32>, vector<16x32xf32> -> vector<16x32xf32>
    %27 = arith.addf %24, %26 : vector<16x32xf32>
    %28 = math.tanh %27 : vector<16x32xf32>
    %29 = vector.shape_cast %28 : vector<16x32xf32> to vector<2x8x32xf32>
    %c0_23 = arith.constant 0 : index
    %c0_24 = arith.constant 0 : index
    %c0_25 = arith.constant 0 : index
    %30 = vector.load %arg7[%c0_23, %c0_24, %c0_25] : memref<2x8x32xf32, #tpu.memory_space<vmem>>, vector<2x8x32xf32>
    tpu.vector_store %arg7[%c0_23, %c0_24, %c0_25], %29 {strides = array<i32>} : memref<2x8x32xf32, #tpu.memory_space<vmem>>, vector<2x8x32xf32>,
    return
  }
  func.func @transform_0(%arg0: i32) -> (i32, i32, i32) {
    %c0_i32 = arith.constant 0 : i32
    %c0_i32_0 = arith.constant 0 : i32
    %c0_i32_1 = arith.constant 0 : i32
    return %arg0, %c0_i32, %c0_i32_0 : i32, i32, i32
  }
  func.func @transform_1(%arg0: i32) -> (i32, i32, i32) {
    %c0_i32 = arith.constant 0 : i32
    %c0_i32_0 = arith.constant 0 : i32
    %c0_i32_1 = arith.constant 0 : i32
    return %arg0, %c0_i32, %c0_i32_0 : i32, i32, i32
  }
  func.func @transform_2(%arg0: i32) -> (i32, i32, i32) {
    %c0_i32 = arith.constant 0 : i32
    %c0_i32_0 = arith.constant 0 : i32
    %c0_i32_1 = arith.constant 0 : i32
    return %arg0, %c0_i32, %c0_i32_0 : i32, i32, i32
  }
  func.func @transform_3(%arg0: i32) -> (i32, i32) {
    %c0_i32 = arith.constant 0 : i32
    %c0_i32_0 = arith.constant 0 : i32
    %c0_i32_1 = arith.constant 0 : i32
    return %c0_i32, %c0_i32_0 : i32, i32
  }
  func.func @transform_4(%arg0: i32) -> (i32, i32) {
    %c0_i32 = arith.constant 0 : i32
    %c0_i32_0 = arith.constant 0 : i32
    %c0_i32_1 = arith.constant 0 : i32
    return %c0_i32, %c0_i32_0 : i32, i32
  }
  func.func @transform_5(%arg0: i32) -> (i32, i32) {
    %c0_i32 = arith.constant 0 : i32
    %c0_i32_0 = arith.constant 0 : i32
    %c0_i32_1 = arith.constant 0 : i32
    return %c0_i32, %c0_i32_0 : i32, i32
  }
  func.func @transform_6(%arg0: i32) -> (i32, i32, i32) {
    %c0_i32 = arith.constant 0 : i32
    %c0_i32_0 = arith.constant 0 : i32
    %c0_i32_1 = arith.constant 0 : i32
    return %arg0, %c0_i32, %c0_i32_0 : i32, i32, i32
  }
  func.func @transform_7(%arg0: i32) -> (i32, i32, i32) {
    %c0_i32 = arith.constant 0 : i32
    %c0_i32_0 = arith.constant 0 : i32
    %c0_i32_1 = arith.constant 0 : i32
    return %arg0, %c0_i32, %c0_i32_0 : i32, i32, i32
  }
}

</mosaic_0001>

<bundles_post_ra>
// kernel: attention_layer.1
= control target key start
LH: loop header
LB: loop body
LE: loop exit
PB: predicated region body
PF: predicated region fallthrough
CT: control target
= control target key end

     0   :  { %vm36_vm0 = vcmask 261120   ;;  %v801_v6 = vmov 0.0   ;;  %s946_s0 = inlined_call_operand.vmem [shape: f32[2,8,32], index: 0, kind: input, shape index: {}]   ;;  %s947_s1 = inlined_call_operand.vmem [shape: f32[2,8,32], index: 1, kind: input, shape index: {}]   ;;  %s948_s2 = inlined_call_operand.vmem [shape: f32[2,1,8], index: 2, kind: input, shape index: {}]   ;;  %s949_s3 = inlined_call_operand.vmem [shape: f32[32,32], index: 3, kind: input, shape index: {}]   ;;  %s950_s4 = inlined_call_operand.vmem [shape: f32[32,32], index: 4, kind: input, shape index: {}]   ;;  %s951_s5 = inlined_call_operand.vmem [shape: f32[32,32], index: 5, kind: input, shape index: {}]   ;;  %s952_s6 = inlined_call_operand.vmem [shape: f32[2,8,32], index: 6, kind: output, shape index: {0}]   ;;  %s953_s7 = inlined_call_operand.hbm [shape: f32[2,8,8], index: 7, kind: output, shape index: {1}]  }
   0x1   :  { %v32_v0 = vld [vmem:[%s949_s3] sm:$0xff]  ;;  %v33_v1 = vld [vmem:[%s949_s3 + $0x8] sm:$0xff]  ;;  %v34_v2 = vld [vmem:[%s949_s3 + $0x10] sm:$0xff]  ;;  %702 = vmatprep.subr.mxu0 %v801_v6 }
   0x2   :  { %v734_v3 = vpack.c.bf16 %v33_v1, %v32_v0  ;;  %v35_v4 = vld [vmem:[%s949_s3 + $0x18] sm:$0xff]  ;;  %v861_v5 = vld [vmem:[%s946_s0] sm:$0xff] }
   0x3   :  { %v738_v7 = vpack.c.bf16 %v35_v4, %v34_v2  ;;  %689 = vmatprep.mubr.msk.f32.mxu1 %vm36_vm0, %v861_v5  ;;  %v28_v8 = vld [vmem:[%s947_s1] sm:$0xff] }
   0x4   :  { %13 = vsyncpa [#allocation3], 0  ;;  %735 = vmatprep.subr.bf16.mxu1 %v734_v3  ;;  %703 = vmatpush3.msra.mxu0 %v28_v8  ;;  %v871_v9 = vld [vmem:[%s946_s0 + $0x8] sm:$0xff]  ;;  %vm802_vm1 = vmmov 0   ;;  %v643_v13 = vld [vmem:[%s948_s2] ss:$0 sm:$0xff] }
   0x5   :  { %737 = vmatpush3.bf16.msra.mxu1 %v734_v3  ;;  %704 = vmatprep.mubr.msk.f32.mxu0 %vm802_vm1, %v801_v6  ;;  %v29_v11 = vld [vmem:[%s947_s1 + $0x8] sm:$0xff]  ;;  %vm282_vm2 = vcmask 64512   ;;  %v644_v17 = vld [vmem:[%s948_s2 + $0x1] ss:$0 sm:$0xff]  ;;  %v459_v38 = vld [vmem:[%s951_s5 + $0x10] sm:$0xff]  ;;  %s803_s9 = smov [#allocation2]  }
   0x6   :  { %739 = vmatprep.subr.bf16.mxu1 %v738_v7  ;;  %v457_v33 = vld [vmem:[%s951_s5] sm:$0xff]  ;;  %v458_v34 = vld [vmem:[%s951_s5 + $0x8] sm:$0xff]  ;;  %v460_v39 = vld [vmem:[%s951_s5 + $0x18] sm:$0xff]  ;;  %s628_s10 = sshll.u32 %s803_s9, 4  ;;  %s629_s10 = int_to_ptr.vmem [resolvable:$true] %s628_s10 }
   0x7   :  { %v742_v35 = vpack.c.bf16 %v458_v34, %v457_v33  ;;  %v746_v42 = vpack.c.bf16 %v460_v39, %v459_v38  ;;  %v453_v43 = vld [vmem:[%s950_s4] sm:$0xff]  ;;  %v454_v44 = vld [vmem:[%s950_s4 + $0x8] sm:$0xff]  ;;  %v455_v48 = vld [vmem:[%s950_s4 + $0x10] sm:$0xff]  ;;  %s777_s11 = scalar_lea.vmem %s629_s10, 256  ;;  %p782_p1 = scmp.lt.s32.totalorder %s629_s10, %s629_s10 }
   0x8   :  { %v750_v47 = vpack.c.bf16 %v454_v44, %v453_v43  ;;  %v456_v49 = vld [vmem:[%s950_s4 + $0x18] sm:$0xff]  ;;  %p778_p0 = scmp.ne.s32.totalorder %s629_s10, %s777_s11  ;;  %p783_p2 = scmp.lt.s32.totalorder %s777_s11, %s777_s11 }
   0x9   :  { %741 = vmatpush3.bf16.msra.mxu1 %v738_v7  ;;  %743 = vmatprep.subr.bf16.mxu0 %v742_v35  ;;  %v754_v50 = vpack.c.bf16 %v456_v49, %v455_v48 }
   0xa   :  { %692 = vmatprep.subr.mxu1 %v801_v6  ;;  %p784_p3 = por %p783_p2, %p782_p1 }
   0xc   :  { %690 = vmatmul.mubr.msk.f32.vlgmr.msra.gmra.mrb[0].mxu1 %vm36_vm0, %v871_v9  ;;  %p785_p4 = pnand %p784_p3, %p778_p0 }
   0xd   :  { %694 = vmatprep.mubr.msk.f32.mxu1 %vm802_vm1, %v801_v6 }
  0x12   :  { %693 = vmatpush3.xpose.msk.msra.mxu1 %vm36_vm0, %v28_v8 }
  0x13   :  { %697 = vmatprep.subr.mxu1 %v801_v6 }
  0xdf   :  { %v691_v10 = vpop.f32.mrb[0].mxu1 }
  0xe0   :  { %v109_v12 = vpop.f32.mrb[1].mxu1 }
  0xe1   :  { %695 = vmatmul.mubr.msk.f32.vlgmr.msra.gmra.mrb[2].mxu1 %vm36_vm0, %v109_v12 }
  0xe2   :  { %698 = vmatpush3.xpose.msk.msra.mxu1 %vm36_vm0, %v29_v11  ;;  %699 = vmatprep.mubr.msk.f32.mxu1 %vm802_vm1, %v801_v6 }
  0xe3   :  { %707 = vmatprep.subr.mxu1 %v801_v6 }
  0xe5   :  { %700 = vmatmul.mubr.msk.f32.vlgmr.msra.gmra.mrb[4].mxu1 %vm36_vm0, %v691_v10 }
  0xe6   :  { %708 = vmatpush3.msra.mxu1 %v29_v11  ;;  %709 = vmatprep.mubr.msk.f32.mxu1 %vm802_vm1, %v801_v6 }
 0x1b4   :  { %v202_v14 = vpop.f32.mrb[2].mxu1 }
 0x1b5   :  { %v203_v15 = vadd.f32 %v643_v13, %v202_v14  ;;  %v696_v16 = vpop.f32.mrb[3].mxu1 }
 0x1b7   :  { %v283_v18 = vsel %vm282_vm2, %v203_v15, -inf }
 0x1b8   :  { %284 = vmax.xlane.f32.xlu0 %v283_v18  ;;  %v278_v19 = vpop.f32.mrb[4].mxu1 }
 0x1b9   :  { %v279_v20 = vadd.f32 %v644_v17, %v278_v19  ;;  %v701_v21 = vpop.f32.mrb[5].mxu1 }
 0x1bb   :  { %v286_v22 = vsel %vm282_vm2, %v279_v20, -inf }
 0x1bc   :  { %287 = vmax.xlane.f32.xlu0 %v286_v22 }
 0x245   :  { %v285_v23 = vpop.xlane.xlu0 %284 }
 0x246   :  { %v289_v24 = vsub.f32 %v203_v15, %v285_v23 }
 0x248   :  { %v291_v25 = vmul.f32 1.442695, %v289_v24 }
 0x249   :  { %v288_v26 = vpop.xlane.xlu0 %287 }
 0x24a   :  { %765 = vpow2.f32 %v291_v25  ;;  %v290_v27 = vsub.f32 %v279_v20, %v288_v26 }
 0x24c   :  { %v293_v28 = vmul.f32 1.442695, %v290_v27 }
 0x24e   :  { %767 = vpow2.f32 %v293_v28 }
 0x254   :  { %v766_v29 = vpop.eup %765 }
 0x255   :  { %v295_v30 = vsel %vm282_vm2, %v766_v29, 0.0 }
 0x256   :  { %296 = vadd.xlane.f32.xlu1 %v295_v30 }
 0x258   :  { %v768_v31 = vpop.eup %767 }
 0x259   :  { %v298_v32 = vsel %vm282_vm2, %v768_v31, 0.0 }
 0x25a   :  { %299 = vadd.xlane.f32.xlu1 %v298_v32 }
 0x2e3   :  { %v297_v36 = vpop.xlane.xlu1 %296 }
 0x2e4   :  { %769 = vrcp.f32 %v297_v36 }
 0x2e7   :  { %v300_v37 = vpop.xlane.xlu1 %299 }
 0x2e8   :  { %771 = vrcp.f32 %v300_v37 }
 0x2ee   :  { %v770_v40 = vpop.eup %769 }
 0x2ef   :  { %v303_v41 = vmul.f32 %v770_v40, %v766_v29 }
 0x2f1   :  { %705 = vmatmul.mubr.msk.f32.vlgmr.msra.gmra.mrb[0].mxu0 %vm282_vm2, %v303_v41  ;;  %305 = vst.msk [vmem:[#allocation2] sm:$0xff] %vm282_vm2, %v303_v41 }
 0x2f2   :  { %v772_v45 = vpop.eup %771  ;;  %745 = vmatpush3.bf16.msra.mxu0 %v742_v35  ;;  %720 = vmatprep.mubr.msk.f32.mxu0 %vm36_vm0, %v861_v5 }
 0x2f3   :  { %v304_v46 = vmul.f32 %v772_v45, %v768_v31  ;;  %747 = vmatprep.subr.bf16.mxu0 %v746_v42 }
 0x2f5   :  { %306 = vst.msk [vmem:[#allocation2 + $0x8] sm:$0xff] %vm282_vm2, %v304_v46  ;;  %710 = vmatmul.mubr.msk.f32.vlgmr.msra.gmra.mrb[6].mxu1 %vm282_vm2, %v304_v46 }
 0x2f6   :  { %749 = vmatpush3.bf16.msra.mxu0 %v746_v42 }
 0x2f7   :  { %751 = vmatprep.subr.bf16.mxu0 %v750_v47 }
 0x2f9   :  { %721 = vmatmul.mubr.msk.f32.vlgmr.msra.gmra.mrb[2].mxu0 %vm36_vm0, %v871_v9 }
 0x2fa   :  { %753 = vmatpush3.bf16.msra.mxu0 %v750_v47 }
 0x2fb   :  { %755 = vmatprep.subr.bf16.mxu0 %v754_v50 }
 0x2fe   :  { %757 = vmatpush3.bf16.msra.mxu0 %v754_v50 }
 0x3c4   :  { %v376_v51 = vpop.f32.mrb[0].mxu0 }
 0x3c5   :  { %v706_v52 = vpop.f32.mrb[1].mxu0  ;;  %731 = vmatprep.mubr.msk.f32.mxu0 %vm36_vm0, %v376_v51 }
 0x3c8   :  { %v449_v53 = vpop.f32.mrb[6].mxu1 }
 0x3c9   :  { %v711_v54 = vpop.f32.mrb[7].mxu1  ;;  %732 = vmatmul.mubr.msk.f32.vlgmr.msra.gmra.mrb[2].mxu0 %vm36_vm0, %v449_v53 }
 0x3ca   :  { %788 = shalt.err (!%p785_p4)
}
 0x3cb   :  { %s789_s3 = scalar_lea.hbm %s953_s7, 256 }
 0x3cc   :  { %p790_p5 = scmp.ne.s32.totalorder %s953_s7, %s789_s3  ;;  %p793_p6 = scmp.lt.u32.totalorder %s789_s3, %s953_s7 }
 0x3ce   :  { %p795_p7 = pnand %p793_p6, %p790_p5 }
 0x3d0   :  { %798 = shalt.err (!%p795_p7)
}
 0x3d1   :  { %s804_s16 = smov 128   ;;  %s805_s1 = smov 8  }
 0x3d2   :  { %634 = dma.vmem_to_hbm [thread:$0]  %s629_s10, 256, %s953_s7, [#allocation3], %s804_s16, %s804_s16, %s805_s1  }
 0x49c   :  { %v733_v55 = vpop.f32.mrb[2].mxu0 }
 0x49d   :  { %773 = vtanh.f32 %v733_v55  ;;  %v608_v56 = vpop.f32.mrb[3].mxu0 }
 0x49e   :  { %775 = vtanh.f32 %v608_v56 }
 0x4a7   :  { %v774_v57 = vpop.eup %773 }
 0x4a8   :  { %v776_v58 = vpop.eup %775  ;;  %620 = vst.msk [vmem:[%s952_s6 + $0x8] sm:$0xff] %vm36_vm0, %v774_v57 }
 0x4a9   :  { %619 = vst.msk [vmem:[%s952_s6] sm:$0xff] %vm36_vm0, %v776_v58 }
 0x4aa   :  { %799 = dma.done.wait [#allocation3], 256  }
 0x4ab   :  { %800 = vsyncadd [#allocation3], 4294967040 }
 0x4ac   :  { %640 = vsyncpa [#allocation3], 1 }

</bundles_post_ra>
